<compile_context>
chip_gen: v5e
topology: v5e:2x2
jax: 0.10.0
libtpu: 0.0.40
codegen_flags: <defaults>
</compile_context>

<pallas_src>
import functools
import math

import jax
import jax.numpy as jnp
from jax.experimental import pallas as pl
from jax.experimental.pallas import tpu as pltpu


def _pick_tile(dim, target, align):
    """Largest tile <= target that divides `dim` and is `align`-aligned.

    Falls back to the full dimension (always a legal BlockSpec block) when the
    dimension is small or no aligned divisor exists.
    """
    if dim <= target:
        return dim
    t = (target // align) * align
    while t >= align:
        if dim % t == 0:
            return t
        t -= align
    return dim


# ---------------------------------------------------------------------------
# Tiled linear:  y = x @ W.T + b        (PyTorch nn.Linear semantics)
# ---------------------------------------------------------------------------
def _linear_kernel(x_ref, w_ref, b_ref, o_ref, acc_ref, *, compute_dtype):
    @pl.when(pl.program_id(2) == 0)
    def _init():
        acc_ref[...] = jnp.zeros_like(acc_ref)

    # W stays in torch layout (D_out, D_in); contract K on both operands so the
    # MXU consumes the transposed RHS natively (no in-kernel transpose).
    acc_ref[...] += jax.lax.dot_general(
        x_ref[...].astype(compute_dtype),
        w_ref[...].astype(compute_dtype),
        dimension_numbers=(((1,), (1,)), ((), ())),
        preferred_element_type=jnp.float32,
    )

    # Bias is added once in the epilogue, not per K step.
    @pl.when(pl.program_id(2) == pl.num_programs(2) - 1)
    def _finalize():
        o_ref[...] = (acc_ref[...] + b_ref[...]).astype(o_ref.dtype)


def linear(x, w, b, *, compute_dtype=jnp.bfloat16, out_dtype=jnp.float32,
           tm_target=256, tn_target=256, tk_target=512):
    """x: (M, K) @ w: (N, K) [torch layout] + b: (N,) -> (M, N) out_dtype.

    MXU operands are cast to compute_dtype (bf16 by default); accumulation is
    f32.  Tile targets suit v6e/v7x; on v7x they can be grown (512/512/1024).
    """
    M, K = x.shape
    N, K2 = w.shape
    assert K == K2 and b.shape == (N,)
    tm = _pick_tile(M, tm_target, 8)
    tn = _pick_tile(N, tn_target, 128)
    tk = _pick_tile(K, tk_target, 128)
    grid = (M // tm, N // tn, K // tk)
    kernel = functools.partial(_linear_kernel, compute_dtype=compute_dtype)
    return pl.pallas_call(
        kernel,
        out_shape=jax.ShapeDtypeStruct((M, N), out_dtype),
        grid=grid,
        in_specs=[
            pl.BlockSpec((tm, tk), lambda i, j, k: (i, k)),
            pl.BlockSpec((tn, tk), lambda i, j, k: (j, k)),
            pl.BlockSpec((1, tn), lambda i, j, k: (0, j)),
        ],
        out_specs=pl.BlockSpec((tm, tn), lambda i, j, k: (i, j)),
        scratch_shapes=[pltpu.VMEM((tm, tn), jnp.float32)],
        compiler_params=pltpu.CompilerParams(
            dimension_semantics=("parallel", "parallel", "arbitrary")),
    )(x, w, b.reshape(1, N))


# ---------------------------------------------------------------------------
# Flash-style multi-head attention, heads packed in the lane dimension.
# Grid = (batch, q tiles, kv tiles); kv axis is the (last, "arbitrary") reduction.
# ---------------------------------------------------------------------------
def _flash_mha_kernel(*refs, num_heads, d_k, tq, tkv, causal, has_mask,
                      compute_dtype, exp_dtype):
    if has_mask:
        q_ref, k_ref, v_ref, mask_ref, o_ref, m_sc, l_sc, acc_sc = refs
    else:
        q_ref, k_ref, v_ref, o_ref, m_sc, l_sc, acc_sc = refs
        mask_ref = None

    ki = pl.program_id(2)

    @pl.when(ki == 0)
    def _init():
        m_sc[...] = jnp.full_like(m_sc, -jnp.inf)
        l_sc[...] = jnp.zeros_like(l_sc)
        acc_sc[...] = jnp.zeros_like(acc_sc)

    def _step():
        if has_mask:
            # int8 mask compared directly against 0 (no widen); one additive
            # f32 bias tile per (b, qi, ki) step shared by all heads.
            neg_bias = jnp.where(mask_ref[0] == 0, jnp.float32(-1.0e9),
                                 jnp.float32(0.0))

        for h in range(num_heads):                       # static unroll over heads
            lo = h * d_k
            q_h = q_ref[0, :, lo:lo + d_k].astype(compute_dtype)  # (tq, d_k), pre-scaled
            k_h = k_ref[0, :, lo:lo + d_k].astype(compute_dtype)  # (tkv, d_k)
            v_h = v_ref[0, :, lo:lo + d_k].astype(compute_dtype)  # (tkv, d_k)

            # scores = q @ k^T via contraction on d_k of both operands (no .T).
            s = jax.lax.dot_general(
                q_h, k_h, dimension_numbers=(((1,), (1,)), ((), ())),
                preferred_element_type=jnp.float32)                # (tq, tkv) f32
            if has_mask:
                s = s + neg_bias                                   # add, not select

            m_prev = m_sc[h]                                       # (tq, 1)
            m_new = jnp.maximum(m_prev, jnp.max(s, axis=-1, keepdims=True))
            alpha = jnp.exp(m_prev - m_new)
            p = jnp.exp((s - m_new).astype(exp_dtype))             # EUP; bf16 on v6e/v7x
            l_sc[h] = alpha * l_sc[h] + jnp.sum(p, axis=-1, keepdims=True,
                                                dtype=jnp.float32)
            acc_sc[h] = alpha * acc_sc[h] + jax.lax.dot_general(
                p.astype(compute_dtype), v_h,
                dimension_numbers=(((1,), (0,)), ((), ())),
                preferred_element_type=jnp.float32)
            m_sc[h] = m_new

    if causal:
        # Skip fully-masked KV tiles (strictly above the diagonal block row).
        qi = pl.program_id(1)
        pl.when(ki * tkv < (qi + 1) * tq)(_step)
    else:
        _step()

    @pl.when(ki == pl.num_programs(2) - 1)
    def _finalize():
        parts = []
        for h in range(num_heads):
            l_h = l_sc[h]
            inv_l = pl.reciprocal(l_h, approx=True)      # EUP slot
            inv_l = inv_l * (2.0 - l_h * inv_l)          # Newton step -> f32 accuracy
            parts.append(acc_sc[h] * inv_l)
        # Single lane-dense (tq, d_model) store instead of num_heads masked
        # 32-lane partial stores.
        o_ref[0] = jnp.concatenate(parts, axis=-1).astype(o_ref.dtype)


def _mha_attention(q_arr, k_arr, v_arr, mask_i8, *, num_heads, d_model,
                   q_col, k_col, v_col, q_block=256, kv_block=256,
                   causal=False, compute_dtype=jnp.bfloat16,
                   exp_dtype=jnp.float32, out_dtype=jnp.float32):
    """Flash attention over head-packed activations.

    q_arr/k_arr/v_arr are (B, S, n*d_model); *_col selects which d_model-wide
    column block holds q/k/v (0 for standalone arrays, 0/1/2 when all three
    point at the same packed QKV buffer).  Q must be pre-scaled by 1/sqrt(d_k).
    mask_i8 is (B, Sq, Skv) int8 or None (no-mask specialization).  `causal`
    is a promise that mask_i8[b, i, j] == 0 whenever j > i (tile skipping).
    Returns the (B, Sq, d_model) context with heads already concatenated.
    """
    B, Sq, _ = q_arr.shape
    _, Skv, _ = k_arr.shape
    d_k = d_model // num_heads
    tq = _pick_tile(Sq, q_block, 8)
    tkv = _pick_tile(Skv, kv_block, 128)   # 128-aligned -> mask block stays legal
    grid = (B, Sq // tq, Skv // tkv)

    has_mask = mask_i8 is not None
    kernel = functools.partial(
        _flash_mha_kernel, num_heads=num_heads, d_k=d_k, tq=tq, tkv=tkv,
        causal=causal, has_mask=has_mask,
        compute_dtype=compute_dtype, exp_dtype=exp_dtype)

    in_specs = [
        pl.BlockSpec((1, tq, d_model), lambda b, qi, ki: (b, qi, q_col)),
        pl.BlockSpec((1, tkv, d_model), lambda b, qi, ki: (b, ki, k_col)),
        pl.BlockSpec((1, tkv, d_model), lambda b, qi, ki: (b, ki, v_col)),
    ]
    args = [q_arr, k_arr, v_arr]
    if has_mask:
        in_specs.append(pl.BlockSpec((1, tq, tkv), lambda b, qi, ki: (b, qi, ki)))
        args.append(mask_i8)

    return pl.pallas_call(
        kernel,
        out_shape=jax.ShapeDtypeStruct((B, Sq, d_model), out_dtype),
        grid=grid,
        in_specs=in_specs,
        out_specs=pl.BlockSpec((1, tq, d_model), lambda b, qi, ki: (b, qi, 0)),
        scratch_shapes=[
            pltpu.VMEM((num_heads, tq, 1), jnp.float32),     # running max  m
            pltpu.VMEM((num_heads, tq, 1), jnp.float32),     # running sum  l
            pltpu.VMEM((num_heads, tq, d_k), jnp.float32),   # output accumulator
        ],
        compiler_params=pltpu.CompilerParams(
            dimension_semantics=("parallel", "parallel", "arbitrary")),
    )(*args)


# ---------------------------------------------------------------------------
# Parameter preparation (done once at weight-load time, not per forward call):
# fold 1/sqrt(d_k) into Wq/bq, build the fused (3D, D) QKV weight, cast MXU
# operands to the compute dtype.
# ---------------------------------------------------------------------------
def prepare_params(params, num_heads, *, compute_dtype=jnp.bfloat16):
    (wq, bq), (wk, bk), (wv, bv), (wo, bo) = params
    d_model = wq.shape[0]
    assert d_model % num_heads == 0
    d_k = d_model // num_heads
    scale = jnp.float32(1.0 / math.sqrt(d_k))
    wq_s, bq_s = wq * scale, bq * scale
    return {
        "num_heads": num_heads,
        "d_model": d_model,
        "compute_dtype": compute_dtype,
        "wq": wq_s.astype(compute_dtype), "bq": bq_s.astype(jnp.float32),
        "wk": wk.astype(compute_dtype),   "bk": bk.astype(jnp.float32),
        "wv": wv.astype(compute_dtype),   "bv": bv.astype(jnp.float32),
        "wo": wo.astype(compute_dtype),   "bo": bo.astype(jnp.float32),
        "w_qkv": jnp.concatenate([wq_s, wk, wv], axis=0).astype(compute_dtype),
        "b_qkv": jnp.concatenate([bq_s, bk, bv], axis=0).astype(jnp.float32),
    }


# ---------------------------------------------------------------------------
# MultiHeadAttention forward
# ---------------------------------------------------------------------------
def multi_head_attention(query, key, value, mask, prepared, *,
                         causal=False, exp_dtype=jnp.float32,
                         q_block=256, kv_block=256):
    """query/key/value: (B, S, d_model); mask: (B, Sq, Skv) or None.

    `prepared` comes from prepare_params().  `causal=True` promises the mask is
    lower-triangular so fully-masked KV tiles can be skipped.  `exp_dtype` can
    be jnp.bfloat16 on v6e/v7x (EUP is bf16-capable); keep f32 on v5e.
    """
    num_heads = prepared["num_heads"]
    d_model = prepared["d_model"]
    compute_dtype = prepared["compute_dtype"]
    B, Sq, _ = query.shape
    Skv = key.shape[1]

    if mask is None:
        mask_i8 = None          # no-mask kernel specialization: no O(B*S^2) DMA
    elif mask.dtype == jnp.int8:
        mask_i8 = mask
    else:
        mask_i8 = (mask != 0).astype(jnp.int8)   # 4x less mask DMA than f32

    # Fused QKV path requires self-attention and a 128-aligned d_model (so a
    # d_model-wide block can index into the packed (B, S, 3*d_model) buffer).
    fused = (query is key) and (query is value) and (d_model % 128 == 0)
    if fused:
        # One fused projection: activations read from HBM once; intermediate
        # stored in compute dtype (bf16) to halve the HBM round-trip.
        qkv = linear(query.reshape(B * Sq, d_model),
                     prepared["w_qkv"], prepared["b_qkv"],
                     compute_dtype=compute_dtype, out_dtype=compute_dtype
                     ).reshape(B, Sq, 3 * d_model)
        ctx = _mha_attention(qkv, qkv, qkv, mask_i8,
                             num_heads=num_heads, d_model=d_model,
                             q_col=0, k_col=1, v_col=2,
                             q_block=q_block, kv_block=kv_block,
                             causal=causal, compute_dtype=compute_dtype,
                             exp_dtype=exp_dtype, out_dtype=compute_dtype)
    else:
        # Cross-attention (or unaligned d_model): separate projections;
        # heads still stay packed in the lane dimension (no transposes).
        q = linear(query.reshape(B * Sq, d_model), prepared["wq"], prepared["bq"],
                   compute_dtype=compute_dtype, out_dtype=compute_dtype
                   ).reshape(B, Sq, d_model)
        k = linear(key.reshape(B * Skv, d_model), prepared["wk"], prepared["bk"],
                   compute_dtype=compute_dtype, out_dtype=compute_dtype
                   ).reshape(B, Skv, d_model)
        v = linear(value.reshape(B * Skv, d_model), prepared["wv"], prepared["bv"],
                   compute_dtype=compute_dtype, out_dtype=compute_dtype
                   ).reshape(B, Skv, d_model)
        ctx = _mha_attention(q, k, v, mask_i8,
                             num_heads=num_heads, d_model=d_model,
                             q_col=0, k_col=0, v_col=0,
                             q_block=q_block, kv_block=kv_block,
                             causal=causal, compute_dtype=compute_dtype,
                             exp_dtype=exp_dtype, out_dtype=compute_dtype)

    # ctx is already (B, Sq, h*d_k) with heads concatenated — no transpose.
    out = linear(ctx.reshape(B * Sq, d_model), prepared["wo"], prepared["bo"],
                 compute_dtype=compute_dtype, out_dtype=jnp.float32)
    return out.reshape(B, Sq, d_model)


# ---------------------------------------------------------------------------
# Pure-JAX reference for correctness checking
# ---------------------------------------------------------------------------
def _reference_mha(query, key, value, mask, params, h):
    B, Sq, D = query.shape
    d_k = D // h
    (wq, bq), (wk, bk), (wv, bv), (wo, bo) = params

    def proj(x, w, b):
        y = x @ w.T + b
        return y.reshape(B, -1, h, d_k).transpose(0, 2, 1, 3)

    q, k, v = proj(query, wq, bq), proj(key, wk, bk), proj(value, wv, bv)
    scores = jnp.einsum("bhqd,bhkd->bhqk", q, k) / math.sqrt(d_k)
    if mask is not None:
        scores = jnp.where(mask[:, None, :, :] == 0, -1.0e9, scores)
    p = jax.nn.softmax(scores, axis=-1)
    x = jnp.einsum("bhqk,bhkd->bhqd", p, v)
    x = x.transpose(0, 2, 1, 3).reshape(B, Sq, D)
    return x @ wo.T + bo


if __name__ == "__main__":
    B, S, D_MODEL, H = 2, 256, 128, 4

    root = jax.random.PRNGKey(0)
    keys = jax.random.split(root, 12)

    # Deterministic nn.Linear-like uniform init.
    bound = 1.0 / math.sqrt(D_MODEL)
    params = []
    for i in range(4):
        w = jax.random.uniform(keys[2 * i], (D_MODEL, D_MODEL), jnp.float32,
                               -bound, bound)
        b = jax.random.uniform(keys[2 * i + 1], (D_MODEL,), jnp.float32,
                               -bound, bound)
        params.append((w, b))

    x = jax.random.normal(keys[8], (B, S, D_MODEL), jnp.float32)
    mem = jax.random.normal(keys[9], (B, S, D_MODEL), jnp.float32)
    # Causal mask (B, S, S); zeros are masked to -1e9 like masked_fill.
    mask = jnp.broadcast_to(jnp.tril(jnp.ones((S, S), jnp.float32)), (B, S, S))

    # 1) bf16 MXU operands (default): self-attention -> fused-QKV path,
    #    causal tile skipping enabled.
    prep_bf16 = prepare_params(params, H, compute_dtype=jnp.bfloat16)
    out_self = jax.block_until_ready(
        multi_head_attention(x, x, x, mask, prep_bf16, causal=True))
    ref_self = _reference_mha(x, x, x, mask, params, H)
    assert out_self.shape == (B, S, D_MODEL)
    assert jnp.allclose(out_self, ref_self, atol=5e-2, rtol=5e-2), \
        float(jnp.max(jnp.abs(out_self - ref_self)))

    # 2) Cross-attention (distinct key/value source) -> separate-projection path.
    out_cross = jax.block_until_ready(
        multi_head_attention(x, mem, mem, mask, prep_bf16, causal=False))
    ref_cross = _reference_mha(x, mem, mem, mask, params, H)
    assert jnp.allclose(out_cross, ref_cross, atol=5e-2, rtol=5e-2), \
        float(jnp.max(jnp.abs(out_cross - ref_cross)))

    # 3) No-mask specialization (mask input dropped from the kernel entirely).
    out_nomask = jax.block_until_ready(
        multi_head_attention(x, x, x, None, prep_bf16))
    ref_nomask = _reference_mha(x, x, x, None, params, H)
    assert jnp.allclose(out_nomask, ref_nomask, atol=5e-2, rtol=5e-2), \
        float(jnp.max(jnp.abs(out_nomask - ref_nomask)))

    # 4) Strict f32 compute path (v5e-safe configuration), tight tolerance.
    prep_f32 = prepare_params(params, H, compute_dtype=jnp.float32)
    out_f32 = jax.block_until_ready(
        multi_head_attention(x, x, x, mask, prep_f32, causal=True))
    assert jnp.allclose(out_f32, ref_self, atol=1e-3, rtol=1e-3), \
        float(jnp.max(jnp.abs(out_f32 - ref_self)))

    print("KERNEL_OK")
</pallas_src>

<mosaic_0001>
module attributes {stable_mosaic.version = 11 : i64} {
  func.func @_linear_kernel(%arg0: i32, %arg1: i32, %arg2: i32, %arg3: memref<256x128xf32, #tpu.memory_space<vmem>>, %arg4: memref<128x128xbf16, #tpu.memory_space<vmem>>, %arg5: memref<1x128xf32, #tpu.memory_space<vmem>>, %arg6: memref<256x128xbf16, #tpu.memory_space<vmem>>, %arg7: memref<256x128xf32, #tpu.memory_space<vmem>>) attributes {dimension_semantics = [#tpu.dimension_semantics<parallel>, #tpu.dimension_semantics<parallel>, #tpu.dimension_semantics<arbitrary>], iteration_bounds = array<i64: 2, 3, 1>, scalar_prefetch = 0 : i64, scratch_operands = 1 : i64, tpu.core_type = #tpu.core_type<tc>, window_params = [{transform_indices = @transform_0, window_bounds = array<i64: 256, 128>}, {transform_indices = @transform_1, window_bounds = array<i64: 128, 128>}, {transform_indices = @transform_2, window_bounds = array<i64: 1, 128>}, {transform_indices = @transform_3, window_bounds = array<i64: 256, 128>}]} {
    %c0_i32 = arith.constant 0 : i32
    %0 = arith.cmpi eq, %arg2, %c0_i32 : i32
    %1 = arith.extui %0 : i1 to i32
    %c0_i32_0 = arith.constant 0 : i32
    %2 = arith.cmpi ne, %1, %c0_i32_0 : i32
    scf.if %2 {
      %cst_10 = arith.constant 0.000000e+00 : f32
      %13 = vector.broadcast %cst_10 : f32 to vector<256x128xf32>
      %c0_11 = arith.constant 0 : index
      %c0_12 = arith.constant 0 : index
      %14 = vector.load %arg7[%c0_11, %c0_12] : memref<256x128xf32, #tpu.memory_space<vmem>>, vector<256x128xf32>
      tpu.vector_store %arg7[%c0_11, %c0_12], %13 {strides = array<i32>} : memref<256x128xf32, #tpu.memory_space<vmem>>, vector<256x128xf32>,
    } else {
    }
    %c0 = arith.constant 0 : index
    %c0_1 = arith.constant 0 : index
    %3 = vector.load %arg7[%c0, %c0_1] : memref<256x128xf32, #tpu.memory_space<vmem>>, vector<256x128xf32>
    %c0_2 = arith.constant 0 : index
    %c0_3 = arith.constant 0 : index
    %4 = vector.load %arg3[%c0_2, %c0_3] : memref<256x128xf32, #tpu.memory_space<vmem>>, vector<256x128xf32>
    %5 = arith.truncf %4 : vector<256x128xf32> to vector<256x128xbf16>
    %c0_4 = arith.constant 0 : index
    %c0_5 = arith.constant 0 : index
    %6 = vector.load %arg4[%c0_4, %c0_5] : memref<128x128xbf16, #tpu.memory_space<vmem>>, vector<128x128xbf16>
    %cst = arith.constant dense<0.000000e+00> : vector<256x128xf32>
    %7 = tpu.matmul %5, %6, %cst {dimension_numbers = #tpu.dot_dimension_numbers<[1], [1], [0], [0], [0, 0, 1, 0], [], []>} : vector<256x128xbf16>, vector<128x128xbf16>, vector<256x128xf32> -> vector<256x128xf32>
    %8 = arith.addf %3, %7 : vector<256x128xf32>
    %c0_6 = arith.constant 0 : index
    %c0_7 = arith.constant 0 : index
    %9 = vector.load %arg7[%c0_6, %c0_7] : memref<256x128xf32, #tpu.memory_space<vmem>>, vector<256x128xf32>
    tpu.vector_store %arg7[%c0_6, %c0_7], %8 {strides = array<i32>} : memref<256x128xf32, #tpu.memory_space<vmem>>, vector<256x128xf32>,
    %c0_i32_8 = arith.constant 0 : i32
    %10 = arith.cmpi eq, %arg2, %c0_i32_8 : i32
    %11 = arith.extui %10 : i1 to i32
    %c0_i32_9 = arith.constant 0 : i32
    %12 = arith.cmpi ne, %11, %c0_i32_9 : i32
    scf.if %12 {
      %c0_10 = arith.constant 0 : index
      %c0_11 = arith.constant 0 : index
      %13 = vector.load %arg7[%c0_10, %c0_11] : memref<256x128xf32, #tpu.memory_space<vmem>>, vector<256x128xf32>
      %c0_12 = arith.constant 0 : index
      %c0_13 = arith.constant 0 : index
      %14 = vector.load %arg5[%c0_12, %c0_13] : memref<1x128xf32, #tpu.memory_space<vmem>>, vector<1x128xf32>
      %15 = vector.broadcast %14 : vector<1x128xf32> to vector<256x128xf32>
      %16 = arith.addf %13, %15 : vector<256x128xf32>
      %17 = arith.truncf %16 : vector<256x128xf32> to vector<256x128xbf16>
      %c0_14 = arith.constant 0 : index
      %c0_15 = arith.constant 0 : index
      %18 = vector.load %arg6[%c0_14, %c0_15] : memref<256x128xbf16, #tpu.memory_space<vmem>>, vector<256x128xbf16>
      tpu.vector_store %arg6[%c0_14, %c0_15], %17 {strides = array<i32>} : memref<256x128xbf16, #tpu.memory_space<vmem>>, vector<256x128xbf16>,
    } else {
    }
    return
  }
  func.func @transform_0(%arg0: i32, %arg1: i32, %arg2: i32) -> (i32, i32) {
    %c0_i32 = arith.constant 0 : i32
    return %arg0, %arg2 : i32, i32
  }
  func.func @transform_1(%arg0: i32, %arg1: i32, %arg2: i32) -> (i32, i32) {
    %c0_i32 = arith.constant 0 : i32
    return %arg1, %arg2 : i32, i32
  }
  func.func @transform_2(%arg0: i32, %arg1: i32, %arg2: i32) -> (i32, i32) {
    %c0_i32 = arith.constant 0 : i32
    %c0_i32_0 = arith.constant 0 : i32
    return %c0_i32, %arg1 : i32, i32
  }
  func.func @transform_3(%arg0: i32, %arg1: i32, %arg2: i32) -> (i32, i32) {
    %c0_i32 = arith.constant 0 : i32
    return %arg0, %arg1 : i32, i32
  }
}

</mosaic_0001>

<bundles_post_ra>
// kernel: tpu_custom_call.1
= control target key start
LH: loop header
LB: loop body
LE: loop exit
PB: predicated region body
PF: predicated region fallthrough
CT: control target
= control target key end

     0   :  { %s1894_s0 = inlined_call_operand.hbm [shape: f32[512,128], index: 0, kind: input, shape index: {}]   ;;  %s1895_s1 = inlined_call_operand.hbm [shape: bf16[384,128], index: 1, kind: input, shape index: {}]   ;;  %s1896_s2 = inlined_call_operand.hbm [shape: f32[1,384], index: 2, kind: input, shape index: {}]   ;;  %s1897_s3 = inlined_call_operand.hbm [shape: bf16[512,384], index: 3, kind: output, shape index: {}]  }
   0x1   :  { %1909 = sst [smem:[#allocation25_spill]] %s1895_s1 }
   0x2   :  { %1910 = sst [smem:[#allocation26_spill]] %s1897_s3 }
   0x3   :  { %8 = vsyncpa [#allocation4], 0 }
   0x4   :  { %10 = vsyncpa [#allocation4 + $0x1], 0 }
   0x5   :  { %11 = vsyncpa [#allocation7], 0 }
   0x6   :  { %13 = vsyncpa [#allocation7 + $0x1], 0 }
   0x7   :  { %14 = vsyncpa [#allocation5], 0 }
   0x8   :  { %16 = vsyncpa [#allocation5 + $0x1], 0  ;;  %s1508_s12 = smov 0   ;;  %s1510_s13 = smov 0  }
   0x9   :  { %s1512_s14 = smov 0   ;;  %s1514_s15 = smov 0  }
   0xa   :  { %s1516_s16 = smov 0   ;;  %s1518_s17 = smov 0  }
   0xb   :  { %s1520_s18 = smov 0   ;;  %s1522_s19 = smov 0  }
   0xc   :  { %s1524_s20 = smov 0   ;;  %s1526_s21 = smov 0  }
   0xd   :  { %s1528_s22 = smov 0   ;;  %s1530_s23 = smov 0  }
   0xe   :  { %s1532_s24 = smov 0   ;;  %s1534_s25 = smov 0  }
   0xf LB: > { %1911 = sst [smem:[#allocation13_spill]] %s1427_s12  ;;  %s1577_s26 = sadd.s32 4294967295, %s1479_s25   ;;  %s1479_s25 = sphi %s1534_s25, %s22_s25   ;;  %s1475_s24 = sphi %s1532_s24, %s1950_s24   ;;  %s1471_s23 = sphi %s1530_s23, %s1960_s23   ;;  %s1467_s22 = sphi %s1528_s22, %s1959_s22   ;;  %s1463_s21 = sphi %s1526_s21, %s1958_s21   ;;  %s1459_s20 = sphi %s1524_s20, %s1947_s20   ;;  %s1455_s19 = sphi %s1522_s19, %s1957_s19   ;;  %s1451_s18 = sphi %s1520_s18, %s1956_s18   ;;  %s1447_s17 = sphi %s1518_s17, %s1955_s17   ;;  %s1443_s16 = sphi %s1516_s16, %s1954_s16   ;;  %s1439_s15 = sphi %s1514_s15, %s1953_s15   ;;  %s1435_s14 = sphi %s1512_s14, %s1944_s14   ;;  %s1431_s13 = sphi %s1510_s13, %s1952_s13   ;;  %s1427_s12 = sphi %s1508_s12, %s1951_s12  }
  0x10   : > { %1912 = sst [smem:[#allocation14_spill]] %s1435_s14  ;;  %s37_s27 = sadd.s32 1, %s1471_s23 }
  0x11   : > { %1913 = sst [smem:[#allocation15_spill]] %s1459_s20  ;;  %p1580_p0 = scmp.ge.s32.totalorder %s37_s27, 3 }
  0x12   : > { %1914 = sst [smem:[#allocation16_spill]] %s1463_s21  ;;  %p58_p1 = scmp.eq.s32.totalorder %s1479_s25, 0 }
  0x13   : > { %1915 = sst [smem:[#allocation17_spill]] %s1467_s22  ;;  %p64_p2 = scmp.eq.s32.totalorder %s1577_s26, 0 }
  0x14   : > { %1916 = sst [smem:[#allocation18_spill]] %s1475_s24  ;;  %s78_s29 = sadd.s32 1, %s1447_s17 }
  0x15   : > { %s1962_s27 = smov (%p1580_p0, %s37_s27), 0  ;;  %p85_p3 = scmp.ne.s32.totalorder %s1447_s17, %s1443_s16 }
  0x16   : > { %1918 = sst [smem:[#allocation19_spill]] %s1962_s27  ;;  %p91_p4 = scmp.ne.s32.totalorder %s1443_s16, %s1439_s15 }
  0x17   : > { %s1596_s30 = ssub.s32 %s1471_s23, %s1962_s27  ;;  %p1602_p7 = por %p85_p3, %p58_p1 }
  0x18   : > { %p76_p6 = scmp.eq.s32.totalorder %s1596_s30, 0  ;;  %p1608_p8 = por %p91_p4, %p64_p2 }
  0x19   : > { %p1901_p9 = scmp.lt.s32.totalorder %s1479_s25, 6  ;;  %s192_s7 = sand.u32 1, %s1479_s25  }
  0x1a   : > { %s1920_s5 = scalar_select %p1608_p8, 1, 0 }
  0x1b   : > { %s1613_s6 = scalar_select %p76_p6, %s1447_s17, %s78_s29  }
  0x1c   : > { %s1900_s8 = sand.u32 1, %s1447_s17   ;;  %s966_s10 = sshll.u32 %s1471_s23, 6 }
  0x1d   : > { %1921 = sst [smem:[#allocation20_spill]] %s1613_s6  ;;  %s920_s9 = sshll.u32 %s1900_s8, 6 }
  0x1e   : > { %s1922_s1 = sld [smem:[#allocation25_spill]]  ;;  %s196_s21 = scalar_lea.vmem [#allocation6], %s920_s9 }
  0x1f   : > { %s205_s29 = sshll.u32 %s196_s21, 4  ;;  %p1628_p10 = pnand %p1901_p9, %p1602_p7  ;;  %s206_s29 = int_to_ptr.vmem [resolvable:$true] %s205_s29 }
  0x20   : > { %p923_p11 = scmp.ge.s32.totalorder %s1479_s25, 1  ;;  %p230_p12 = scmp.lt.s32.totalorder %s1479_s25, 7 }
  0x21   : > { %s1481_s21 = smov 64   ;;  %s1482_s4 = smov 4  }
  0x22   : > { %p1639_p13 = pnand %p923_p11, %p230_p12  ;;  %s41_s11 = sadd.s32 1, %s1475_s24 }
  0x23   : > { %s50_s15 = sadd.s32 1, %s1459_s20  ;;  %s1964_s11 = smov (!%p1580_p0, %s41_s11), %s1475_s24 }
  0x24   : > { %s202_s27 = scalar_lea.hbm %s1922_s1, %s966_s10  ;;  %s914_s10 = sadd.s32 4294967294, %s1479_s25  }
  0x25   : > { %s203_s3 = sshll.u32 %s202_s27, 4  ;;  %s1634_s27 = scalar_lea.sflag [#allocation7], %s192_s7  ;;  %s204_s3 = int_to_ptr.hbm [resolvable:$true] %s203_s3 }
  0x26   : > { %1109 = dma.hbm_to_vmem [thread:$0]  (!%p1628_p10), %s204_s3, 1024, %s206_s29, %s1634_s27, %s1481_s21, %s1481_s21, %s1482_s4  }
  0x27   : > { %p57_p3 = scmp.ne.s32.totalorder %s1459_s20, %s1455_s19  ;;  %p63_p4 = scmp.ne.s32.totalorder %s1455_s19, %s1451_s18 }
  0x28   : > { %p43_p6 = scmp.ge.s32.totalorder %s1964_s11, 2  ;;  %s132_s7 = sadd.s32 1, %s1435_s14 }
  0x29   : > { %p1656_p7 = por %p58_p1, %p57_p3  ;;  %p1662_p11 = por %p64_p2, %p63_p4 }
  0x2a   : > { %s1966_s11 = smov (%p43_p6, %s1964_s11), 0  ;;  %p142_p0 = scmp.ne.s32.totalorder %s1435_s14, %s1431_s13 }
  0x2b   : > { %1927 = sst [smem:[#allocation21_spill]] %s1966_s11  ;;  %p148_p12 = scmp.ne.s32.totalorder %s1431_s13, %s1427_s12 }
  0x2c   : > { %s45_s18 = ssub.s32 %s1475_s24, %s1966_s11  ;;  %p149_p9 = scmp.eq.s32.totalorder %s914_s10, 5 }
  0x2d   : > { %p48_p5 = scmp.eq.s32.totalorder %s45_s18, 0  ;;  %s129_s28 = sor.u32 %s1596_s30, %s45_s18 }
  0x2e   : > { %p130_p1 = scmp.eq.s32.totalorder %s129_s28, 0  ;;  %p1928_p3 = scmp.eq.s32.totalorder %s1577_s26, 5 }
  0x2f   : > { %s1682_s4 = scalar_select %p48_p5, %s1459_s20, %s50_s15  }
  0x30   : > { %p1677_p8 = por %p1928_p3, %p142_p0  ;;  %p1687_p2 = por %p149_p9, %p148_p12 }
  0x31   : > { %1930 = sst [smem:[#allocation22_spill]] %s1682_s4  ;;  %s169_s10 = sand.u32 1, %s1459_s20  }
  0x32   : > { %s1685_s1 = scalar_select %p130_p1, %s1435_s14, %s132_s7  }
  0x33   : > { %s1932_s6 = scalar_select %p1687_p2, 1, 0 }
  0x34   : > { %1931 = sst [smem:[#allocation23_spill]] %s1685_s1  ;;  %s917_s11 = sshll.u32 %s169_s10, 8 }
  0x35   : > { %1933 = sst [smem:[#allocation24_spill]] %s1932_s6  ;;  %s965_s12 = sshll.u32 %s1475_s24, 8 }
  0x36   : > { %s179_s28 = scalar_lea.hbm %s1894_s0, %s965_s12  ;;  %s173_s22 = scalar_lea.vmem [#allocation3], %s917_s11 }
  0x37   : > { %s182_s15 = sshll.u32 %s173_s22, 4  ;;  %s180_s4 = sshll.u32 %s179_s28, 4  ;;  %s183_s15 = int_to_ptr.vmem [resolvable:$true] %s182_s15  ;;  %s181_s4 = int_to_ptr.hbm [resolvable:$true] %s180_s4 }
  0x38   : > { %p1934_p5 = scmp.lt.s32.totalorder %s1479_s25, 6  ;;  %s170_s7 = scalar_lea.sflag [#allocation4], %s169_s10 }
  0x39   : > { %s1483_s1 = smov 128   ;;  %s1484_s14 = smov 8  }
  0x3a   : > { %p1104_p9 = pnand %p1934_p5, %p1656_p7  ;;  %s221_s6 = scalar_lea.hbm %s1896_s2, %s1471_s23 }
  0x3b   : > { %s1935_s30 = sand.u32 1, %s1447_s17   ;;  %s223_s18 = sshll.u32 %s221_s6, 4  ;;  %s224_s18 = int_to_ptr.hbm [resolvable:$true] %s223_s18 }
  0x3c   : > { %1106 = dma.hbm_to_vmem [thread:$0]  (!%p1104_p9), %s181_s4, 4096, %s183_s15, %s170_s7, %s1483_s1, %s1483_s1, %s1484_s14  }
  0x3d   : > { %s218_s12 = scalar_lea.vmem [#allocation8], %s1935_s30  ;;  %234 = sbr.rel (%p1639_p13) target bundleno = 335 (0x14f), region = 32 }
  0x3e   : > { %s225_s11 = sshll.u32 %s218_s12, 4  ;;  %s236_s22 = sand.u32 (!%p1639_p13), 1, %s1455_s19   ;;  %s226_s11 = int_to_ptr.vmem [resolvable:$true] %s225_s11 }
  0x3f   : > { %1112 = dma.hbm_to_vmem [thread:$0]  (!%p1628_p10), %s224_s18, 16, %s226_s11, %s1634_s27  }
  0x40   : > { %s924_s3 = sshll.u32 (!%p1639_p13), %s236_s22, 8  ;;  %s237_s1 = scalar_lea.sflag (!%p1639_p13), [#allocation4], %s236_s22 }
  0x41   : > { %s1712_s14 = scalar_lea.vmem (!%p1639_p13), [#allocation3], %s924_s3 }
  0x42   : > { %1414 = dma.done.wait (%p1662_p11), %s237_s1, 4096  }
  0x43   : > { %1416 = vsyncadd (%p1662_p11), %s237_s1, 4294963200  ;;  %s246_s20 = sand.u32 1, %s1577_s26   ;;  %s248_s24 = sand.u32 1, %s1443_s16  }
  0x44   : > { %s925_s6 = sshll.u32 %s248_s24, 6  ;;  %s247_s8 = scalar_lea.sflag [#allocation7], %s246_s20 }
  0x45   : > { %s1720_s27 = scalar_lea.vmem [#allocation6], %s925_s6  ;;  %p1936_p10 = scmp.ne.s32.totalorder %s1920_s5, 0 }
  0x47   : > { %1418 = dma.done.wait (%p1936_p10), %s247_s8, 1040  }
  0x48   : > { %1420 = vsyncadd (%p1936_p10), %s247_s8, 4294966256  ;;  %v974_v0 = vld [vmem:[%s1720_s27 + $0x38] sm:$0xff]  ;;  %s1727_s9 = scalar_lea.vmem [#allocation8], %s248_s24  ;;  %v973_v1 = vld [vmem:[%s1720_s27 + $0x30] sm:$0xff]  ;;  %s289_s26 = sand.u32 1, %s1431_s13  }
  0x49   : > { %475 = vmatpush.bf16.xpose.msra.mxu0 %v974_v0  ;;  %1070 = vmatpush.bf16.xpose.msra.mxu1 %v974_v0  ;;  %v972_v2 = vld [vmem:[%s1720_s27 + $0x28] sm:$0xff]  ;;  %v971_v3 = vld [vmem:[%s1720_s27 + $0x20] sm:$0xff]  ;;  %v970_v4 = vld [vmem:[%s1720_s27 + $0x18] sm:$0xff]  ;;  %s926_s5 = sshll.u32 %s289_s26, 7  ;;  %s1937_s4 = sld [smem:[#allocation17_spill]] }
  0x4a   : > { %1071 = vmatpush.bf16.xpose.msra.mxu2 %v974_v0  ;;  %1072 = vmatpush.bf16.xpose.msra.mxu3 %v974_v0  ;;  %v969_v5 = vld [vmem:[%s1720_s27 + $0x10] sm:$0xff]  ;;  %v968_v6 = vld [vmem:[%s1720_s27 + $0x8] sm:$0xff]  ;;  %v967_v7 = vld [vmem:[%s1720_s27] sm:$0xff]  ;;  %s1778_s29 = scalar_lea.vmem [#allocation9], %s926_s5  ;;  %s1938_s10 = sld [smem:[#allocation16_spill]] }
  0x4b   : > { %v363_v8 = vld [vmem:[%s1712_s14] sm:$0xff]  ;;  %v364_v9 = vld [vmem:[%s1712_s14 + $0x8] sm:$0xff]  ;;  %v365_v20 = vld [vmem:[%s1712_s14 + $0x10] sm:$0xff]  ;;  %s1939_s11 = sld [smem:[#allocation26_spill]]  ;;  %s778_s22 = sshll.u32 %s1778_s29, 4  ;;  %s779_s22 = int_to_ptr.vmem [resolvable:$true] %s778_s22 }
  0x4c   : > { %v371_v10 = vld [vmem:[%s1712_s14 + $0x40] sm:$0xff]  ;;  %v372_v11 = vld [vmem:[%s1712_s14 + $0x48] sm:$0xff]  ;;  %v395_v16 = vpack.c.bf16 %v364_v9, %v363_v8  ;;  %v366_v21 = vld [vmem:[%s1712_s14 + $0x18] sm:$0xff]  ;;  %s764_s1 = scalar_lea.sflag [#allocation5], %s289_s26 }
  0x4d   : > { %v379_v12 = vld [vmem:[%s1712_s14 + $0x80] sm:$0xff]  ;;  %v380_v13 = vld [vmem:[%s1712_s14 + $0x88] sm:$0xff]  ;;  %v399_v17 = vpack.c.bf16 %v372_v11, %v371_v10  ;;  %v373_v22 = vld [vmem:[%s1712_s14 + $0x50] sm:$0xff]  ;;  %v396_v28 = vpack.c.bf16 %v366_v21, %v365_v20 }
  0x4e   : > { %v387_v14 = vld [vmem:[%s1712_s14 + $0xc0] sm:$0xff]  ;;  %v388_v15 = vld [vmem:[%s1712_s14 + $0xc8] sm:$0xff]  ;;  %v403_v18 = vpack.c.bf16 %v380_v13, %v379_v12  ;;  %v374_v23 = vld [vmem:[%s1712_s14 + $0x58] sm:$0xff] }
  0x4f   : > { %v407_v19 = vpack.c.bf16 %v388_v15, %v387_v14  ;;  %v381_v24 = vld [vmem:[%s1712_s14 + $0x90] sm:$0xff]  ;;  %v382_v25 = vld [vmem:[%s1712_s14 + $0x98] sm:$0xff]  ;;  %v400_v29 = vpack.c.bf16 %v374_v23, %v373_v22  ;;  %v367_v32 = vld [vmem:[%s1712_s14 + $0x20] sm:$0xff]  ;;  %s1094_s28 = smul.u32 96, %s1937_s4 }
  0x50   : > { %v389_v26 = vld [vmem:[%s1712_s14 + $0xd0] sm:$0xff]  ;;  %v390_v27 = vld [vmem:[%s1712_s14 + $0xd8] sm:$0xff]  ;;  %v404_v30 = vpack.c.bf16 %v382_v25, %v381_v24  ;;  %v368_v33 = vld [vmem:[%s1712_s14 + $0x28] sm:$0xff] }
  0x51   : > { %476 = vmatpush.bf16.xpose.msra.mxu0 %v973_v1  ;;  %1073 = vmatpush.bf16.xpose.msra.mxu1 %v973_v1  ;;  %v408_v31 = vpack.c.bf16 %v390_v27, %v389_v26  ;;  %v375_v34 = vld [vmem:[%s1712_s14 + $0x60] sm:$0xff]  ;;  %v376_v35 = vld [vmem:[%s1712_s14 + $0x68] sm:$0xff]  ;;  %v397_v40 = vpack.c.bf16 %v368_v33, %v367_v32  ;;  %v369_v44 = vld [vmem:[%s1712_s14 + $0x30] sm:$0xff]  ;;  %s775_s15 = sadd.s32 %s1938_s10, %s1094_s28  ;;  %s1349_s8 = scalar_lea.hbm %s1939_s11, 768 }
  0x52   : > { %1074 = vmatpush.bf16.xpose.msra.mxu2 %v973_v1  ;;  %1075 = vmatpush.bf16.xpose.msra.mxu3 %v973_v1  ;;  %v383_v36 = vld [vmem:[%s1712_s14 + $0xa0] sm:$0xff]  ;;  %v384_v37 = vld [vmem:[%s1712_s14 + $0xa8] sm:$0xff]  ;;  %v401_v41 = vpack.c.bf16 %v376_v35, %v375_v34  ;;  %v370_v45 = vld [vmem:[%s1712_s14 + $0x38] sm:$0xff]  ;;  %s962_s7 = sshll.u32 %s775_s15, 2 }
  0x53   : > { %v391_v38 = vld [vmem:[%s1712_s14 + $0xe0] sm:$0xff]  ;;  %v392_v39 = vld [vmem:[%s1712_s14 + $0xe8] sm:$0xff]  ;;  %v405_v42 = vpack.c.bf16 %v384_v37, %v383_v36  ;;  %v377_v46 = vld [vmem:[%s1712_s14 + $0x70] sm:$0xff]  ;;  %v398_v52 = vpack.c.bf16 %v370_v45, %v369_v44  ;;  %s777_s18 = scalar_lea.hbm %s1939_s11, %s962_s7 }
  0x54   : > { %v409_v43 = vpack.c.bf16 %v392_v39, %v391_v38  ;;  %v378_v47 = vld [vmem:[%s1712_s14 + $0x78] sm:$0xff]  ;;  %v385_v48 = vld [vmem:[%s1712_s14 + $0xb0] sm:$0xff]  ;;  %v1770_v58 = vld [vmem:[%s1727_s9] ss:$0 sm:$0xff]  ;;  %s780_s3 = sshll.u32 %s777_s18, 4  ;;  %s781_s3 = int_to_ptr.hbm [resolvable:$true] %s780_s3 }
  0x55   : > { %v386_v49 = vld [vmem:[%s1712_s14 + $0xb8] sm:$0xff]  ;;  %v393_v50 = vld [vmem:[%s1712_s14 + $0xf0] sm:$0xff]  ;;  %v402_v53 = vpack.c.bf16 %v378_v47, %v377_v46 }
  0x56   : > { %v394_v51 = vld [vmem:[%s1712_s14 + $0xf8] sm:$0xff]  ;;  %v406_v54 = vpack.c.bf16 %v386_v49, %v385_v48  ;;  %s1343_s14 = sshra.s32 %s781_s3, 4  ;;  %s1344_s14 = int_to_ptr.hbm [resolvable:$true] %s1343_s14 }
  0x57   : > { %v410_v55 = vpack.c.bf16 %v394_v51, %v393_v50  ;;  %s1345_s20 = scalar_lea.hbm %s1344_s14, 128  ;;  %p1350_p7 = scmp.lt.s32.totalorder %s1344_s14, %s1939_s11 }
  0x58   : > { %p1346_p13 = scmp.ne.s32.totalorder %s1344_s14, %s1345_s20  ;;  %p1351_p11 = scmp.lt.s32.totalorder %s1349_s8, %s1345_s20 }
  0x59   : > { %477 = vmatpush.bf16.xpose.msra.mxu0 %v972_v2  ;;  %1076 = vmatpush.bf16.xpose.msra.mxu1 %v972_v2 }
  0x5a   : > { %1077 = vmatpush.bf16.xpose.msra.mxu2 %v972_v2  ;;  %1078 = vmatpush.bf16.xpose.msra.mxu3 %v972_v2  ;;  %p1347_p4 = pnand %p1346_p13, %p1677_p8  ;;  %p1352_p0 = por %p1351_p11, %p1350_p7 }
  0x5c   : > { %p1348_p6 = pneg %p1347_p4 }
  0x5e   : > { %p1353_p12 = pnand %p1352_p0, %p1348_p6 }
  0x61   : > { %478 = vmatpush.bf16.xpose.msra.mxu0 %v971_v3  ;;  %1079 = vmatpush.bf16.xpose.msra.mxu1 %v971_v3 }
  0x62   : > { %1080 = vmatpush.bf16.xpose.msra.mxu2 %v971_v3  ;;  %1081 = vmatpush.bf16.xpose.msra.mxu3 %v971_v3 }
  0x69   : > { %479 = vmatpush.bf16.xpose.msra.mxu0 %v970_v4  ;;  %1082 = vmatpush.bf16.xpose.msra.mxu1 %v970_v4 }
  0x6a   : > { %1083 = vmatpush.bf16.xpose.msra.mxu2 %v970_v4  ;;  %1084 = vmatpush.bf16.xpose.msra.mxu3 %v970_v4 }
  0x71   : > { %480 = vmatpush.bf16.xpose.msra.mxu0 %v969_v5  ;;  %1085 = vmatpush.bf16.xpose.msra.mxu1 %v969_v5 }
  0x72   : > { %1086 = vmatpush.bf16.xpose.msra.mxu2 %v969_v5  ;;  %1087 = vmatpush.bf16.xpose.msra.mxu3 %v969_v5 }
  0x79   : > { %481 = vmatpush.bf16.xpose.msra.mxu0 %v968_v6  ;;  %1088 = vmatpush.bf16.xpose.msra.mxu1 %v968_v6 }
  0x7a   : > { %1089 = vmatpush.bf16.xpose.msra.mxu2 %v968_v6  ;;  %1090 = vmatpush.bf16.xpose.msra.mxu3 %v968_v6 }
  0x81   : > { %482 = vmatpush.bf16.xpose.msra.mxu0 %v967_v7  ;;  %1091 = vmatpush.bf16.xpose.msra.mxu1 %v967_v7 }
  0x82   : > { %1092 = vmatpush.bf16.xpose.msra.mxu2 %v967_v7  ;;  %1093 = vmatpush.bf16.xpose.msra.mxu3 %v967_v7 }
  0x88   : > { %483 = vmatmul.bf16.vlgmr.msra.gmra.mxu0 %v395_v16  ;;  %503 = vmatmul.bf16.vlgmr.msra.gmra.mxu1 %v399_v17 }
  0x89   : > { %523 = vmatmul.bf16.vlgmr.msra.gmra.mxu2 %v403_v18  ;;  %543 = vmatmul.bf16.vlgmr.msra.gmra.mxu3 %v407_v19 }
  0x98   : > { %488 = vmatmul.bf16.gmra.mxu0 %v396_v28  ;;  %508 = vmatmul.bf16.gmra.mxu1 %v400_v29 }
  0x99   : > { %528 = vmatmul.bf16.gmra.mxu2 %v404_v30  ;;  %548 = vmatmul.bf16.gmra.mxu3 %v408_v31 }
  0xa8   : > { %493 = vmatmul.bf16.gmra.mxu0 %v397_v40  ;;  %513 = vmatmul.bf16.gmra.mxu1 %v401_v41 }
  0xa9   : > { %533 = vmatmul.bf16.gmra.mxu2 %v405_v42  ;;  %553 = vmatmul.bf16.gmra.mxu3 %v409_v43 }
  0xb8   : > { %498 = vmatmul.bf16.gmra.mxu0 %v398_v52  ;;  %518 = vmatmul.bf16.gmra.mxu1 %v402_v53 }
  0xb9   : > { %538 = vmatmul.bf16.gmra.mxu2 %v406_v54  ;;  %558 = vmatmul.bf16.gmra.mxu3 %v410_v55 }
 0x105   : > { %v484_v56 = vpop.f32.mrf.mxu0  ;;  %v504_v57 = vpop.f32.mrf.mxu1 }
 0x106   : > { %v667_v63 = vadd.f32 %v1770_v58, %v484_v56  ;;  %v675_v0 = vadd.f32 %v1770_v58, %v504_v57 }
 0x10c   : > { %v524_v59 = vpop.f32.mrf.mxu2  ;;  %v544_v60 = vpop.f32.mrf.mxu3 }
 0x10d   : > { %v486_v61 = vpop.f32.mrf.mxu0  ;;  %v506_v62 = vpop.f32.mrf.mxu1  ;;  %v683_v7 = vadd.f32 %v1770_v58, %v524_v59  ;;  %v691_v8 = vadd.f32 %v1770_v58, %v544_v60 }
 0x10e   : > { %v668_v1 = vadd.f32 %v1770_v58, %v486_v61  ;;  %v676_v2 = vadd.f32 %v1770_v58, %v506_v62 }
 0x110   : > { %v978_v3 = vpack.c.bf16 %v668_v1, %v667_v63  ;;  %v998_v4 = vpack.c.bf16 %v676_v2, %v675_v0 }
 0x112   : > { %979 = vst [vmem:[%s1778_s29] sm:$0xff] %v978_v3  }
 0x113   : > { %1058 = vst [vmem:[%s1778_s29 + $0x20] sm:$0xff] %v998_v4  }
 0x114   : > { %v526_v5 = vpop.f32.mrf.mxu2  ;;  %v546_v6 = vpop.f32.mrf.mxu3 }
 0x115   : > { %v684_v9 = vadd.f32 %v1770_v58, %v526_v5  ;;  %v692_v10 = vadd.f32 %v1770_v58, %v546_v6  ;;  %v489_v11 = vpop.f32.mrf.mxu0  ;;  %v509_v12 = vpop.f32.mrf.mxu1 }
 0x116   : > { %v669_v19 = vadd.f32 %v1770_v58, %v489_v11  ;;  %v677_v20 = vadd.f32 %v1770_v58, %v509_v12 }
 0x117   : > { %v1018_v13 = vpack.c.bf16 %v684_v9, %v683_v7  ;;  %v1038_v14 = vpack.c.bf16 %v692_v10, %v691_v8 }
 0x119   : > { %1062 = vst [vmem:[%s1778_s29 + $0x40] sm:$0xff] %v1018_v13  }
 0x11a   : > { %1066 = vst [vmem:[%s1778_s29 + $0x60] sm:$0xff] %v1038_v14  }
 0x11c   : > { %v529_v15 = vpop.f32.mrf.mxu2  ;;  %v549_v16 = vpop.f32.mrf.mxu3 }
 0x11d   : > { %v491_v17 = vpop.f32.mrf.mxu0  ;;  %v511_v18 = vpop.f32.mrf.mxu1  ;;  %v685_v27 = vadd.f32 %v1770_v58, %v529_v15  ;;  %v693_v28 = vadd.f32 %v1770_v58, %v549_v16 }
 0x11e   : > { %v670_v21 = vadd.f32 %v1770_v58, %v491_v17  ;;  %v678_v22 = vadd.f32 %v1770_v58, %v511_v18 }
 0x120   : > { %v983_v23 = vpack.c.bf16 %v670_v21, %v669_v19  ;;  %v1003_v24 = vpack.c.bf16 %v678_v22, %v677_v20 }
 0x122   : > { %1055 = vst [vmem:[%s1778_s29 + $0x8] sm:$0xff] %v983_v23  }
 0x123   : > { %1059 = vst [vmem:[%s1778_s29 + $0x28] sm:$0xff] %v1003_v24  }
 0x124   : > { %v531_v25 = vpop.f32.mrf.mxu2  ;;  %v551_v26 = vpop.f32.mrf.mxu3 }
 0x125   : > { %v686_v29 = vadd.f32 %v1770_v58, %v531_v25  ;;  %v694_v30 = vadd.f32 %v1770_v58, %v551_v26  ;;  %v494_v31 = vpop.f32.mrf.mxu0  ;;  %v514_v32 = vpop.f32.mrf.mxu1 }
 0x126   : > { %v671_v39 = vadd.f32 %v1770_v58, %v494_v31  ;;  %v679_v40 = vadd.f32 %v1770_v58, %v514_v32 }
 0x127   : > { %v1023_v33 = vpack.c.bf16 %v686_v29, %v685_v27  ;;  %v1043_v34 = vpack.c.bf16 %v694_v30, %v693_v28 }
 0x129   : > { %1063 = vst [vmem:[%s1778_s29 + $0x48] sm:$0xff] %v1023_v33  }
 0x12a   : > { %1067 = vst [vmem:[%s1778_s29 + $0x68] sm:$0xff] %v1043_v34  }
 0x12c   : > { %v534_v35 = vpop.f32.mrf.mxu2  ;;  %v554_v36 = vpop.f32.mrf.mxu3 }
 0x12d   : > { %v496_v37 = vpop.f32.mrf.mxu0  ;;  %v516_v38 = vpop.f32.mrf.mxu1  ;;  %v687_v47 = vadd.f32 %v1770_v58, %v534_v35  ;;  %v695_v48 = vadd.f32 %v1770_v58, %v554_v36 }
 0x12e   : > { %v672_v41 = vadd.f32 %v1770_v58, %v496_v37  ;;  %v680_v42 = vadd.f32 %v1770_v58, %v516_v38 }
 0x130   : > { %v988_v43 = vpack.c.bf16 %v672_v41, %v671_v39  ;;  %v1008_v44 = vpack.c.bf16 %v680_v42, %v679_v40 }
 0x132   : > { %1056 = vst [vmem:[%s1778_s29 + $0x10] sm:$0xff] %v988_v43  }
 0x133   : > { %1060 = vst [vmem:[%s1778_s29 + $0x30] sm:$0xff] %v1008_v44  }
 0x134   : > { %v536_v45 = vpop.f32.mrf.mxu2  ;;  %v556_v46 = vpop.f32.mrf.mxu3 }
 0x135   : > { %v688_v49 = vadd.f32 %v1770_v58, %v536_v45  ;;  %v696_v50 = vadd.f32 %v1770_v58, %v556_v46  ;;  %v499_v51 = vpop.f32.mrf.mxu0  ;;  %v519_v52 = vpop.f32.mrf.mxu1 }
 0x136   : > { %v673_v60 = vadd.f32 %v1770_v58, %v499_v51  ;;  %v681_v61 = vadd.f32 %v1770_v58, %v519_v52 }
 0x137   : > { %v1028_v53 = vpack.c.bf16 %v688_v49, %v687_v47  ;;  %v1048_v54 = vpack.c.bf16 %v696_v50, %v695_v48 }
 0x139   : > { %1064 = vst [vmem:[%s1778_s29 + $0x50] sm:$0xff] %v1028_v53  }
 0x13a   : > { %1068 = vst [vmem:[%s1778_s29 + $0x70] sm:$0xff] %v1048_v54  }
 0x13c   : > { %v539_v55 = vpop.f32.mrf.mxu2  ;;  %v559_v56 = vpop.f32.mrf.mxu3 }
 0x13d   : > { %v501_v57 = vpop.f32.mrf.mxu0  ;;  %v521_v59 = vpop.f32.mrf.mxu1  ;;  %v689_v4 = vadd.f32 %v1770_v58, %v539_v55  ;;  %v697_v5 = vadd.f32 %v1770_v58, %v559_v56 }
 0x13e   : > { %v674_v62 = vadd.f32 %v1770_v58, %v501_v57  ;;  %v682_v63 = vadd.f32 %v1770_v58, %v521_v59 }
 0x140   : > { %v993_v0 = vpack.c.bf16 %v674_v62, %v673_v60  ;;  %v1013_v1 = vpack.c.bf16 %v682_v63, %v681_v61 }
 0x142   : > { %1057 = vst [vmem:[%s1778_s29 + $0x18] sm:$0xff] %v993_v0  }
 0x143   : > { %1061 = vst [vmem:[%s1778_s29 + $0x38] sm:$0xff] %v1013_v1  }
 0x144   : > { %v541_v2 = vpop.f32.mrf.mxu2  ;;  %v561_v3 = vpop.f32.mrf.mxu3 }
 0x145   : > { %v690_v6 = vadd.f32 %v1770_v58, %v541_v2  ;;  %v698_v7 = vadd.f32 %v1770_v58, %v561_v3 }
 0x147   : > { %v1033_v8 = vpack.c.bf16 %v690_v6, %v689_v4  ;;  %v1053_v9 = vpack.c.bf16 %v698_v7, %v697_v5 }
 0x149   : > { %1065 = vst [vmem:[%s1778_s29 + $0x58] sm:$0xff] %v1033_v8  }
 0x14a   : > { %1069 = vst [vmem:[%s1778_s29 + $0x78] sm:$0xff] %v1053_v9  }
 0x14b   : > { %1356 = shalt.err (!%p1353_p12)
}
 0x14c   : > { %s1485_s26 = smov 64   ;;  %s1486_s5 = smov 192  }
 0x14d   : > { %s1487_s29 = smov 4  }
 0x14e   : > { %1101 = dma.vmem_to_hbm [thread:$0]  (%p1677_p8), %s779_s22, 2048, %s781_s3, %s764_s1, %s1485_s26, %s1486_s5, %s1487_s29  }
 0x14f PF: > { %s1940_s4 = sld [smem:[#allocation13_spill]]  ;;  %p1118_p1 = scmp.ge.s32.totalorder %s1479_s25, 2 }
 0x151   : > { %p1114_p3 = pnand %p1118_p1, %p1687_p2 }
 0x153   : > { %p1115_p5 = pneg %p1114_p3 }
 0x155   : > { %s795_s28 = sand.u32 1, %s1940_s4  }
 0x156   : > { %s796_s15 = scalar_lea.sflag [#allocation5], %s795_s28 }
 0x157   : > { %1422 = dma.done.wait (%p1115_p5), %s796_s15, 2048  }
 0x158   : > { %1424 = vsyncadd (%p1115_p5), %s796_s15, 4294965248  ;;  %s22_s25 = sadd.s32 1, %s1479_s25   ;;  %s1943_s21 = sld [smem:[#allocation14_spill]] }
 0x159   : > { %p1847_p9 = scmp.ge.s32.totalorder %s22_s25, 8   ;;  %s1944_s14 = sld [smem:[#allocation23_spill]] }
 0x15a   : > { %s1945_s30 = sld [smem:[#allocation20_spill]]  ;;  %s1951_s12 = smov %s1431_s13 }
 0x15b   : > { %s1946_s22 = sld [smem:[#allocation15_spill]]  ;;  %s1953_s15 = smov %s1443_s16 }
 0x15c   : > { %s1947_s20 = sld [smem:[#allocation22_spill]]  ;;  %s1954_s16 = smov %s1447_s17 }
 0x15d   : > { %s1948_s3 = sld [smem:[#allocation18_spill]]  ;;  %s1956_s18 = smov %s1455_s19 }
 0x15e   : > { %s1949_s1 = sld [smem:[#allocation19_spill]]  ;;  %s1952_s13 = smov %s1943_s21 }
 0x15f   : > { %s1950_s24 = sld [smem:[#allocation21_spill]]  ;;  %s1958_s21 = smov %s1471_s23 }
 0x160   : > { %s1955_s17 = smov %s1945_s30  ;;  %21 = sbr.rel (!%p1847_p9) target bundleno = 15 (0xf), region = 109 }
 0x161   : > { %s1957_s19 = smov %s1946_s22 }
 0x163   : > { %s1959_s22 = smov %s1948_s3 }
 0x164   : > { %s1960_s23 = smov %s1949_s1 }
 0x165   :  { %802 = vsyncpa [#allocation4], 1 }
 0x166   :  { %804 = vsyncpa [#allocation4 + $0x1], 1 }
 0x167   :  { %805 = vsyncpa [#allocation7], 1 }
 0x168   :  { %807 = vsyncpa [#allocation7 + $0x1], 1 }
 0x169   :  { %808 = vsyncpa [#allocation5], 1 }
 0x16a   :  { %810 = vsyncpa [#allocation5 + $0x1], 1 }

</bundles_post_ra>
